<compile_context>
chip_gen: v5e
topology: v5e:2x2
jax: 0.10.0
libtpu: 0.0.40
codegen_flags: <defaults>
</compile_context>

<pallas_src>
import math

import jax
import jax.numpy as jnp
from jax import lax
from jax.experimental import pallas as pl
from jax.experimental.pallas import tpu as pltpu

NEG_SLOPE = 0.01   # nn.LeakyReLU default
EPS = 1e-5         # nn.LayerNorm default
EXPANSION = 4


# ----------------------------------------------------------------------------
# helpers
# ----------------------------------------------------------------------------
def _round_up(x, m):
    return ((x + m - 1) // m) * m


def _probe_buffered():
    # pipeline_mode=pl.Buffered(1) (single-buffered resident operands); fall back
    # to default double-buffering on older jax versions.
    try:
        pl.BlockSpec((8, 128), lambda i: (0, 0), pipeline_mode=pl.Buffered(1))
        return True
    except Exception:
        return False


_HAS_BUFFERED = _probe_buffered()
_WEIGHT_BUFFERS = 1 if _HAS_BUFFERED else 2


def _resident_spec(shape):
    nd = len(shape)
    idx = lambda *_: (0,) * nd
    if _HAS_BUFFERED:
        return pl.BlockSpec(tuple(shape), idx, pipeline_mode=pl.Buffered(1))
    return pl.BlockSpec(tuple(shape), idx)


def _ln_lrelu(h):
    # LayerNorm (gamma=1, beta=0, biased variance) followed by LeakyReLU, in f32.
    # TODO(synk): trained elementwise_affine LayerNorm params are not modeled.
    mu = jnp.mean(h, axis=-1, keepdims=True)
    var = jnp.mean(jnp.square(h - mu), axis=-1, keepdims=True)
    hn = (h - mu) * lax.rsqrt(var + EPS)
    return jnp.where(hn >= 0, hn, NEG_SLOPE * hn)


def _matmul_bias(h, w_ref, b_ref):
    # bf16 operands on the MXU, f32 accumulation; bias add in f32.
    return jnp.dot(h.astype(jnp.bfloat16), w_ref[...],
                   preferred_element_type=jnp.float32) + b_ref[...]


# ----------------------------------------------------------------------------
# fused EnhancedResidualBlock kernels (one row-tile per grid step)
# ----------------------------------------------------------------------------
def _residual_kernel_ident(x_ref, w1_ref, b1_ref, w2_ref, b2_ref, o_ref):
    r = x_ref[...]                                  # residual (identity adjust)
    h = _ln_lrelu(r)
    h = _matmul_bias(h, w1_ref, b1_ref)
    h = _ln_lrelu(h)                                # (tm, mid) LN+LeakyReLU in f32
    h = _matmul_bias(h, w2_ref, b2_ref)
    # TODO(synk): nn.Dropout is identity at inference; training-time dropout not modeled.
    o_ref[...] = h + r


def _residual_kernel_adjust(x_ref, wa_ref, ba_ref, w1_ref, b1_ref, w2_ref, b2_ref, o_ref):
    r = _ln_lrelu(_matmul_bias(x_ref[...], wa_ref, ba_ref))   # adjust_dim = Linear + norm_act
    h = _ln_lrelu(r)
    h = _matmul_bias(h, w1_ref, b1_ref)
    h = _ln_lrelu(h)
    h = _matmul_bias(h, w2_ref, b2_ref)
    o_ref[...] = h + r


# ----------------------------------------------------------------------------
# VMEM budgeting / tile selection
# ----------------------------------------------------------------------------
def _vmem_estimate(tm, din, dout, weight_bytes):
    mid = EXPANSION * dout
    # double-buffered f32 input/output tiles (pipeline)
    act_io = 2 * tm * din * 4 + 2 * tm * dout * 4
    # in-kernel live intermediates (upper bound):
    #   f32 (tm, mid) post-matmul1, its bf16 copy feeding matmul2,
    #   f32 residual r (tm, dout) live to the final add, one (tm, dout) temp,
    #   bf16 copy of the (tm, din) input feeding the first matmul.
    live = tm * mid * 4 + tm * mid * 2 + 2 * tm * dout * 4 + tm * din * 2
    return act_io + live + weight_bytes * _WEIGHT_BUFFERS


def _vmem_budget_and_cap():
    """Per-generation (budget_for_tiles, vmem_limit_cap)."""
    cap_bytes = 64 << 20
    try:
        cap_bytes = int(pltpu.get_tpu_info().vmem_capacity_bytes)
    except Exception:
        pass
    if cap_bytes >= (96 << 20):          # v5e / v6e: 128 MiB VMEM
        return 56 << 20, 96 << 20
    return 20 << 20, 32 << 20            # v7x: 64 MiB VMEM (32 MiB default scoped)


def _pick_tm(m, din, dout, weight_bytes, budget):
    tm = 1024 if budget >= (40 << 20) else 512
    while tm > 64 and _vmem_estimate(tm, din, dout, weight_bytes) > budget:
        tm //= 2
    tm = max(8, min(tm, _round_up(m, 8)))
    # Guarantee >= 2 grid steps whenever possible so v7x megacore can split the
    # ("parallel",) axis across both TensorCores.
    if m > 8 and pl.cdiv(m, tm) < 2:
        tm = max(8, _round_up(pl.cdiv(m, 2), 8))
    return tm


# ----------------------------------------------------------------------------
# wrapper
# ----------------------------------------------------------------------------
def enhanced_residual_block(x, params):
    """x: (B, S, Din) f32 -> (B, S, Dout) f32."""
    B, S, Din = x.shape
    Dout = params["w2"].shape[-1]
    M = B * S

    has_adjust = "wa" in params
    if has_adjust:
        kernel = _residual_kernel_adjust
        wargs = (params["wa"], params["ba"], params["w1"], params["b1"],
                 params["w2"], params["b2"])
    else:
        kernel = _residual_kernel_ident
        wargs = (params["w1"], params["b1"], params["w2"], params["b2"])
    weight_bytes = sum(int(a.size) * a.dtype.itemsize for a in wargs)

    budget, limit_cap = _vmem_budget_and_cap()
    tm = _pick_tm(M, Din, Dout, weight_bytes, budget)

    # No padding / trimming: ragged last block is handled by Pallas (OOB writeback
    # dropped; rows are independent so garbage rows in the last tile are harmless).
    x2 = x.reshape(M, Din)
    if x2.dtype != jnp.float32:
        x2 = x2.astype(jnp.float32)

    est = _vmem_estimate(tm, Din, Dout, weight_bytes)
    vmem_limit = int(min(max(2 * est, 4 << 20), limit_cap))

    in_specs = [pl.BlockSpec((tm, Din), lambda i: (i, 0))]
    in_specs += [_resident_spec(a.shape) for a in wargs]

    out = pl.pallas_call(
        kernel,
        out_shape=jax.ShapeDtypeStruct((M, Dout), jnp.float32),
        grid=(pl.cdiv(M, tm),),
        in_specs=in_specs,
        out_specs=pl.BlockSpec((tm, Dout), lambda i: (i, 0)),
        compiler_params=pltpu.CompilerParams(
            dimension_semantics=("parallel",),
            vmem_limit_bytes=vmem_limit),
    )(x2, *wargs)

    return out.reshape(B, S, Dout)


# ----------------------------------------------------------------------------
# deterministic parameter init (weights stored as (in, out) == torch W.T, bf16)
# ----------------------------------------------------------------------------
def _linear_init(key, fan_in, fan_out):
    kw, kb = jax.random.split(key)
    bound = 1.0 / math.sqrt(fan_in)
    w = jax.random.uniform(kw, (fan_in, fan_out), jnp.float32, -bound, bound)
    b = jax.random.uniform(kb, (1, fan_out), jnp.float32, -bound, bound)
    return w.astype(jnp.bfloat16), b        # bf16 weights (MXU operands), f32 bias


def init_block_params(key, in_dim, out_dim, expansion=EXPANSION):
    mid = out_dim * expansion
    keys = jax.random.split(key, 3)
    p = {}
    if in_dim != out_dim:
        p["wa"], p["ba"] = _linear_init(keys[0], in_dim, out_dim)
    p["w1"], p["b1"] = _linear_init(keys[1], out_dim, mid)
    p["w2"], p["b2"] = _linear_init(keys[2], mid, out_dim)
    return p


# ----------------------------------------------------------------------------
# pure-JAX reference (same bf16 matmul contract) for a sanity check
# ----------------------------------------------------------------------------
def _ref_block(x, p):
    def mm(h, w, b):
        return jnp.dot(h.astype(jnp.bfloat16), w,
                       preferred_element_type=jnp.float32) + b
    if "wa" in p:
        r = _ln_lrelu(mm(x, p["wa"], p["ba"]))
    else:
        r = x
    h = _ln_lrelu(r)
    h = mm(h, p["w1"], p["b1"])
    h = _ln_lrelu(h)
    h = mm(h, p["w2"], p["b2"])
    return h + r


if __name__ == "__main__":
    B, S = 2, 8
    d_in, d_hid, d_out = 32, 32, 64   # block1: identity adjust; block2: Linear adjust

    key = jax.random.PRNGKey(0)
    kx, k1, k2 = jax.random.split(key, 3)
    x = jax.random.normal(kx, (B, S, d_in), jnp.float32)
    p1 = init_block_params(k1, d_in, d_hid)     # in == out -> nn.Identity path
    p2 = init_block_params(k2, d_hid, d_out)    # in != out -> Linear + norm_act path

    @jax.jit
    def fwd(x, p1, p2):
        h = enhanced_residual_block(x, p1)
        return enhanced_residual_block(h, p2)

    out = jax.block_until_ready(fwd(x, p1, p2))
    assert out.shape == (B, S, d_out), out.shape
    assert bool(jnp.all(jnp.isfinite(out)))

    ref = _ref_block(_ref_block(x, p1), p2)
    assert bool(jnp.allclose(out, ref, atol=1e-3, rtol=1e-3)), \
        float(jnp.max(jnp.abs(out - ref)))

    print("KERNEL_OK")
</pallas_src>

<mosaic_0001>
module attributes {stable_mosaic.version = 11 : i64} {
  func.func @_residual_kernel_ident(%arg0: i32, %arg1: memref<8x32xf32, #tpu.memory_space<vmem>>, %arg2: memref<32x128xbf16, #tpu.memory_space<vmem>>, %arg3: memref<1x128xf32, #tpu.memory_space<vmem>>, %arg4: memref<128x32xbf16, #tpu.memory_space<vmem>>, %arg5: memref<1x32xf32, #tpu.memory_space<vmem>>, %arg6: memref<8x32xf32, #tpu.memory_space<vmem>>) attributes {dimension_semantics = [#tpu.dimension_semantics<parallel>], iteration_bounds = array<i64: 2>, scalar_prefetch = 0 : i64, scratch_operands = 0 : i64, tpu.core_type = #tpu.core_type<tc>, window_params = [{transform_indices = @transform_0, window_bounds = array<i64: 8, 32>}, {pipeline_mode = #tpu.pipeline_mode<synchronous>, transform_indices = @transform_1, window_bounds = array<i64: 32, 128>}, {pipeline_mode = #tpu.pipeline_mode<synchronous>, transform_indices = @transform_2, window_bounds = array<i64: 1, 128>}, {pipeline_mode = #tpu.pipeline_mode<synchronous>, transform_indices = @transform_3, window_bounds = array<i64: 128, 32>}, {pipeline_mode = #tpu.pipeline_mode<synchronous>, transform_indices = @transform_4, window_bounds = array<i64: 1, 32>}, {transform_indices = @transform_5, window_bounds = array<i64: 8, 32>}]} {
    %c0 = arith.constant 0 : index
    %c0_0 = arith.constant 0 : index
    %0 = vector.load %arg1[%c0, %c0_0] : memref<8x32xf32, #tpu.memory_space<vmem>>, vector<8x32xf32>
    %cst = arith.constant dense<0.000000e+00> : vector<8xf32>
    %1 = vector.multi_reduction <add>, %0, %cst [1] : vector<8x32xf32> to vector<8xf32>
    %2 = vector.shape_cast %1 : vector<8xf32> to vector<8x1xf32>
    %cst_1 = arith.constant 3.200000e+01 : f32
    %3 = vector.broadcast %cst_1 : f32 to vector<8x1xf32>
    %4 = arith.divf %2, %3 : vector<8x1xf32>
    %5 = vector.broadcast %4 : vector<8x1xf32> to vector<8x32xf32>
    %6 = arith.subf %0, %5 : vector<8x32xf32>
    %7 = arith.mulf %6, %6 : vector<8x32xf32>
    %cst_2 = arith.constant dense<0.000000e+00> : vector<8xf32>
    %8 = vector.multi_reduction <add>, %7, %cst_2 [1] : vector<8x32xf32> to vector<8xf32>
    %9 = vector.shape_cast %8 : vector<8xf32> to vector<8x1xf32>
    %cst_3 = arith.constant 3.200000e+01 : f32
    %10 = vector.broadcast %cst_3 : f32 to vector<8x1xf32>
    %11 = arith.divf %9, %10 : vector<8x1xf32>
    %12 = vector.broadcast %4 : vector<8x1xf32> to vector<8x32xf32>
    %13 = arith.subf %0, %12 : vector<8x32xf32>
    %cst_4 = arith.constant 9.99999974E-6 : f32
    %14 = vector.broadcast %cst_4 : f32 to vector<8x1xf32>
    %15 = arith.addf %11, %14 : vector<8x1xf32>
    %16 = math.rsqrt %15 : vector<8x1xf32>
    %17 = vector.broadcast %16 : vector<8x1xf32> to vector<8x32xf32>
    %18 = arith.mulf %13, %17 : vector<8x32xf32>
    %cst_5 = arith.constant 0.000000e+00 : f32
    %19 = vector.broadcast %cst_5 : f32 to vector<8x32xf32>
    %20 = arith.cmpf oge, %18, %19 : vector<8x32xf32>
    %cst_6 = arith.constant 0.00999999977 : f32
    %21 = vector.broadcast %cst_6 : f32 to vector<8x32xf32>
    %22 = arith.mulf %21, %18 : vector<8x32xf32>
    %23 = arith.select %20, %18, %22 : vector<8x32xi1>, vector<8x32xf32>
    %24 = arith.truncf %23 : vector<8x32xf32> to vector<8x32xbf16>
    %c0_7 = arith.constant 0 : index
    %c0_8 = arith.constant 0 : index
    %25 = vector.load %arg2[%c0_7, %c0_8] : memref<32x128xbf16, #tpu.memory_space<vmem>>, vector<32x128xbf16>
    %cst_9 = arith.constant dense<0.000000e+00> : vector<8x128xf32>
    %26 = tpu.matmul %24, %25, %cst_9 {dimension_numbers = #tpu.dot_dimension_numbers<[1], [0], [0], [1], [0, 0, 1, 1], [], []>} : vector<8x32xbf16>, vector<32x128xbf16>, vector<8x128xf32> -> vector<8x128xf32>
    %c0_10 = arith.constant 0 : index
    %c0_11 = arith.constant 0 : index
    %27 = vector.load %arg3[%c0_10, %c0_11] : memref<1x128xf32, #tpu.memory_space<vmem>>, vector<1x128xf32>
    %28 = vector.broadcast %27 : vector<1x128xf32> to vector<8x128xf32>
    %29 = arith.addf %26, %28 : vector<8x128xf32>
    %cst_12 = arith.constant dense<0.000000e+00> : vector<8xf32>
    %30 = vector.multi_reduction <add>, %29, %cst_12 [1] : vector<8x128xf32> to vector<8xf32>
    %31 = vector.shape_cast %30 : vector<8xf32> to vector<8x1xf32>
    %cst_13 = arith.constant 1.280000e+02 : f32
    %32 = vector.broadcast %cst_13 : f32 to vector<8x1xf32>
    %33 = arith.divf %31, %32 : vector<8x1xf32>
    %34 = vector.broadcast %33 : vector<8x1xf32> to vector<8x128xf32>
    %35 = arith.subf %29, %34 : vector<8x128xf32>
    %36 = arith.mulf %35, %35 : vector<8x128xf32>
    %cst_14 = arith.constant dense<0.000000e+00> : vector<8xf32>
    %37 = vector.multi_reduction <add>, %36, %cst_14 [1] : vector<8x128xf32> to vector<8xf32>
    %38 = vector.shape_cast %37 : vector<8xf32> to vector<8x1xf32>
    %cst_15 = arith.constant 1.280000e+02 : f32
    %39 = vector.broadcast %cst_15 : f32 to vector<8x1xf32>
    %40 = arith.divf %38, %39 : vector<8x1xf32>
    %41 = vector.broadcast %33 : vector<8x1xf32> to vector<8x128xf32>
    %42 = arith.subf %29, %41 : vector<8x128xf32>
    %cst_16 = arith.constant 9.99999974E-6 : f32
    %43 = vector.broadcast %cst_16 : f32 to vector<8x1xf32>
    %44 = arith.addf %40, %43 : vector<8x1xf32>
    %45 = math.rsqrt %44 : vector<8x1xf32>
    %46 = vector.broadcast %45 : vector<8x1xf32> to vector<8x128xf32>
    %47 = arith.mulf %42, %46 : vector<8x128xf32>
    %cst_17 = arith.constant 0.000000e+00 : f32
    %48 = vector.broadcast %cst_17 : f32 to vector<8x128xf32>
    %49 = arith.cmpf oge, %47, %48 : vector<8x128xf32>
    %cst_18 = arith.constant 0.00999999977 : f32
    %50 = vector.broadcast %cst_18 : f32 to vector<8x128xf32>
    %51 = arith.mulf %50, %47 : vector<8x128xf32>
    %52 = arith.select %49, %47, %51 : vector<8x128xi1>, vector<8x128xf32>
    %53 = arith.truncf %52 : vector<8x128xf32> to vector<8x128xbf16>
    %c0_19 = arith.constant 0 : index
    %c0_20 = arith.constant 0 : index
    %54 = vector.load %arg4[%c0_19, %c0_20] : memref<128x32xbf16, #tpu.memory_space<vmem>>, vector<128x32xbf16>
    %cst_21 = arith.constant dense<0.000000e+00> : vector<8x32xf32>
    %55 = tpu.matmul %53, %54, %cst_21 {dimension_numbers = #tpu.dot_dimension_numbers<[1], [0], [0], [1], [0, 0, 1, 1], [], []>} : vector<8x128xbf16>, vector<128x32xbf16>, vector<8x32xf32> -> vector<8x32xf32>
    %c0_22 = arith.constant 0 : index
    %c0_23 = arith.constant 0 : index
    %56 = vector.load %arg5[%c0_22, %c0_23] : memref<1x32xf32, #tpu.memory_space<vmem>>, vector<1x32xf32>
    %57 = vector.broadcast %56 : vector<1x32xf32> to vector<8x32xf32>
    %58 = arith.addf %55, %57 : vector<8x32xf32>
    %59 = arith.addf %58, %0 : vector<8x32xf32>
    %c0_24 = arith.constant 0 : index
    %c0_25 = arith.constant 0 : index
    %60 = vector.load %arg6[%c0_24, %c0_25] : memref<8x32xf32, #tpu.memory_space<vmem>>, vector<8x32xf32>
    tpu.vector_store %arg6[%c0_24, %c0_25], %59 {strides = array<i32>} : memref<8x32xf32, #tpu.memory_space<vmem>>, vector<8x32xf32>,
    return
  }
  func.func @transform_0(%arg0: i32) -> (i32, i32) {
    %c0_i32 = arith.constant 0 : i32
    %c0_i32_0 = arith.constant 0 : i32
    return %arg0, %c0_i32 : i32, i32
  }
  func.func @transform_1(%arg0: i32) -> (i32, i32) {
    %c0_i32 = arith.constant 0 : i32
    %c0_i32_0 = arith.constant 0 : i32
    %c0_i32_1 = arith.constant 0 : i32
    return %c0_i32, %c0_i32_0 : i32, i32
  }
  func.func @transform_2(%arg0: i32) -> (i32, i32) {
    %c0_i32 = arith.constant 0 : i32
    %c0_i32_0 = arith.constant 0 : i32
    %c0_i32_1 = arith.constant 0 : i32
    return %c0_i32, %c0_i32_0 : i32, i32
  }
  func.func @transform_3(%arg0: i32) -> (i32, i32) {
    %c0_i32 = arith.constant 0 : i32
    %c0_i32_0 = arith.constant 0 : i32
    %c0_i32_1 = arith.constant 0 : i32
    return %c0_i32, %c0_i32_0 : i32, i32
  }
  func.func @transform_4(%arg0: i32) -> (i32, i32) {
    %c0_i32 = arith.constant 0 : i32
    %c0_i32_0 = arith.constant 0 : i32
    %c0_i32_1 = arith.constant 0 : i32
    return %c0_i32, %c0_i32_0 : i32, i32
  }
  func.func @transform_5(%arg0: i32) -> (i32, i32) {
    %c0_i32 = arith.constant 0 : i32
    %c0_i32_0 = arith.constant 0 : i32
    return %arg0, %c0_i32 : i32, i32
  }
}

module attributes {stable_mosaic.version = 11 : i64} {
  func.func @_residual_kernel_adjust(%arg0: i32, %arg1: memref<8x32xf32, #tpu.memory_space<vmem>>, %arg2: memref<32x64xbf16, #tpu.memory_space<vmem>>, %arg3: memref<1x64xf32, #tpu.memory_space<vmem>>, %arg4: memref<64x256xbf16, #tpu.memory_space<vmem>>, %arg5: memref<1x256xf32, #tpu.memory_space<vmem>>, %arg6: memref<256x64xbf16, #tpu.memory_space<vmem>>, %arg7: memref<1x64xf32, #tpu.memory_space<vmem>>, %arg8: memref<8x64xf32, #tpu.memory_space<vmem>>) attributes {dimension_semantics = [#tpu.dimension_semantics<parallel>], iteration_bounds = array<i64: 2>, scalar_prefetch = 0 : i64, scratch_operands = 0 : i64, tpu.core_type = #tpu.core_type<tc>, window_params = [{transform_indices = @transform_0, window_bounds = array<i64: 8, 32>}, {pipeline_mode = #tpu.pipeline_mode<synchronous>, transform_indices = @transform_1, window_bounds = array<i64: 32, 64>}, {pipeline_mode = #tpu.pipeline_mode<synchronous>, transform_indices = @transform_2, window_bounds = array<i64: 1, 64>}, {pipeline_mode = #tpu.pipeline_mode<synchronous>, transform_indices = @transform_3, window_bounds = array<i64: 64, 256>}, {pipeline_mode = #tpu.pipeline_mode<synchronous>, transform_indices = @transform_4, window_bounds = array<i64: 1, 256>}, {pipeline_mode = #tpu.pipeline_mode<synchronous>, transform_indices = @transform_5, window_bounds = array<i64: 256, 64>}, {pipeline_mode = #tpu.pipeline_mode<synchronous>, transform_indices = @transform_6, window_bounds = array<i64: 1, 64>}, {transform_indices = @transform_7, window_bounds = array<i64: 8, 64>}]} {
    %c0 = arith.constant 0 : index
    %c0_0 = arith.constant 0 : index
    %0 = vector.load %arg1[%c0, %c0_0] : memref<8x32xf32, #tpu.memory_space<vmem>>, vector<8x32xf32>
    %1 = arith.truncf %0 : vector<8x32xf32> to vector<8x32xbf16>
    %c0_1 = arith.constant 0 : index
    %c0_2 = arith.constant 0 : index
    %2 = vector.load %arg2[%c0_1, %c0_2] : memref<32x64xbf16, #tpu.memory_space<vmem>>, vector<32x64xbf16>
    %cst = arith.constant dense<0.000000e+00> : vector<8x64xf32>
    %3 = tpu.matmul %1, %2, %cst {dimension_numbers = #tpu.dot_dimension_numbers<[1], [0], [0], [1], [0, 0, 1, 1], [], []>} : vector<8x32xbf16>, vector<32x64xbf16>, vector<8x64xf32> -> vector<8x64xf32>
    %c0_3 = arith.constant 0 : index
    %c0_4 = arith.constant 0 : index
    %4 = vector.load %arg3[%c0_3, %c0_4] : memref<1x64xf32, #tpu.memory_space<vmem>>, vector<1x64xf32>
    %5 = vector.broadcast %4 : vector<1x64xf32> to vector<8x64xf32>
    %6 = arith.addf %3, %5 : vector<8x64xf32>
    %cst_5 = arith.constant dense<0.000000e+00> : vector<8xf32>
    %7 = vector.multi_reduction <add>, %6, %cst_5 [1] : vector<8x64xf32> to vector<8xf32>
    %8 = vector.shape_cast %7 : vector<8xf32> to vector<8x1xf32>
    %cst_6 = arith.constant 6.400000e+01 : f32
    %9 = vector.broadcast %cst_6 : f32 to vector<8x1xf32>
    %10 = arith.divf %8, %9 : vector<8x1xf32>
    %11 = vector.broadcast %10 : vector<8x1xf32> to vector<8x64xf32>
    %12 = arith.subf %6, %11 : vector<8x64xf32>
    %13 = arith.mulf %12, %12 : vector<8x64xf32>
    %cst_7 = arith.constant dense<0.000000e+00> : vector<8xf32>
    %14 = vector.multi_reduction <add>, %13, %cst_7 [1] : vector<8x64xf32> to vector<8xf32>
    %15 = vector.shape_cast %14 : vector<8xf32> to vector<8x1xf32>
    %cst_8 = arith.constant 6.400000e+01 : f32
    %16 = vector.broadcast %cst_8 : f32 to vector<8x1xf32>
    %17 = arith.divf %15, %16 : vector<8x1xf32>
    %18 = vector.broadcast %10 : vector<8x1xf32> to vector<8x64xf32>
    %19 = arith.subf %6, %18 : vector<8x64xf32>
    %cst_9 = arith.constant 9.99999974E-6 : f32
    %20 = vector.broadcast %cst_9 : f32 to vector<8x1xf32>
    %21 = arith.addf %17, %20 : vector<8x1xf32>
    %22 = math.rsqrt %21 : vector<8x1xf32>
    %23 = vector.broadcast %22 : vector<8x1xf32> to vector<8x64xf32>
    %24 = arith.mulf %19, %23 : vector<8x64xf32>
    %cst_10 = arith.constant 0.000000e+00 : f32
    %25 = vector.broadcast %cst_10 : f32 to vector<8x64xf32>
    %26 = arith.cmpf oge, %24, %25 : vector<8x64xf32>
    %cst_11 = arith.constant 0.00999999977 : f32
    %27 = vector.broadcast %cst_11 : f32 to vector<8x64xf32>
    %28 = arith.mulf %27, %24 : vector<8x64xf32>
    %29 = arith.select %26, %24, %28 : vector<8x64xi1>, vector<8x64xf32>
    %cst_12 = arith.constant dense<0.000000e+00> : vector<8xf32>
    %30 = vector.multi_reduction <add>, %29, %cst_12 [1] : vector<8x64xf32> to vector<8xf32>
    %31 = vector.shape_cast %30 : vector<8xf32> to vector<8x1xf32>
    %cst_13 = arith.constant 6.400000e+01 : f32
    %32 = vector.broadcast %cst_13 : f32 to vector<8x1xf32>
    %33 = arith.divf %31, %32 : vector<8x1xf32>
    %34 = vector.broadcast %33 : vector<8x1xf32> to vector<8x64xf32>
    %35 = arith.subf %29, %34 : vector<8x64xf32>
    %36 = arith.mulf %35, %35 : vector<8x64xf32>
    %cst_14 = arith.constant dense<0.000000e+00> : vector<8xf32>
    %37 = vector.multi_reduction <add>, %36, %cst_14 [1] : vector<8x64xf32> to vector<8xf32>
    %38 = vector.shape_cast %37 : vector<8xf32> to vector<8x1xf32>
    %cst_15 = arith.constant 6.400000e+01 : f32
    %39 = vector.broadcast %cst_15 : f32 to vector<8x1xf32>
    %40 = arith.divf %38, %39 : vector<8x1xf32>
    %41 = vector.broadcast %33 : vector<8x1xf32> to vector<8x64xf32>
    %42 = arith.subf %29, %41 : vector<8x64xf32>
    %cst_16 = arith.constant 9.99999974E-6 : f32
    %43 = vector.broadcast %cst_16 : f32 to vector<8x1xf32>
    %44 = arith.addf %40, %43 : vector<8x1xf32>
    %45 = math.rsqrt %44 : vector<8x1xf32>
    %46 = vector.broadcast %45 : vector<8x1xf32> to vector<8x64xf32>
    %47 = arith.mulf %42, %46 : vector<8x64xf32>
    %cst_17 = arith.constant 0.000000e+00 : f32
    %48 = vector.broadcast %cst_17 : f32 to vector<8x64xf32>
    %49 = arith.cmpf oge, %47, %48 : vector<8x64xf32>
    %cst_18 = arith.constant 0.00999999977 : f32
    %50 = vector.broadcast %cst_18 : f32 to vector<8x64xf32>
    %51 = arith.mulf %50, %47 : vector<8x64xf32>
    %52 = arith.select %49, %47, %51 : vector<8x64xi1>, vector<8x64xf32>
    %53 = arith.truncf %52 : vector<8x64xf32> to vector<8x64xbf16>
    %c0_19 = arith.constant 0 : index
    %c0_20 = arith.constant 0 : index
    %54 = vector.load %arg4[%c0_19, %c0_20] : memref<64x256xbf16, #tpu.memory_space<vmem>>, vector<64x256xbf16>
    %cst_21 = arith.constant dense<0.000000e+00> : vector<8x256xf32>
    %55 = tpu.matmul %53, %54, %cst_21 {dimension_numbers = #tpu.dot_dimension_numbers<[1], [0], [0], [1], [0, 0, 1, 1], [], []>} : vector<8x64xbf16>, vector<64x256xbf16>, vector<8x256xf32> -> vector<8x256xf32>
    %c0_22 = arith.constant 0 : index
    %c0_23 = arith.constant 0 : index
    %56 = vector.load %arg5[%c0_22, %c0_23] : memref<1x256xf32, #tpu.memory_space<vmem>>, vector<1x256xf32>
    %57 = vector.broadcast %56 : vector<1x256xf32> to vector<8x256xf32>
    %58 = arith.addf %55, %57 : vector<8x256xf32>
    %cst_24 = arith.constant dense<0.000000e+00> : vector<8xf32>
    %59 = vector.multi_reduction <add>, %58, %cst_24 [1] : vector<8x256xf32> to vector<8xf32>
    %60 = vector.shape_cast %59 : vector<8xf32> to vector<8x1xf32>
    %cst_25 = arith.constant 2.560000e+02 : f32
    %61 = vector.broadcast %cst_25 : f32 to vector<8x1xf32>
    %62 = arith.divf %60, %61 : vector<8x1xf32>
    %63 = vector.broadcast %62 : vector<8x1xf32> to vector<8x256xf32>
    %64 = arith.subf %58, %63 : vector<8x256xf32>
    %65 = arith.mulf %64, %64 : vector<8x256xf32>
    %cst_26 = arith.constant dense<0.000000e+00> : vector<8xf32>
    %66 = vector.multi_reduction <add>, %65, %cst_26 [1] : vector<8x256xf32> to vector<8xf32>
    %67 = vector.shape_cast %66 : vector<8xf32> to vector<8x1xf32>
    %cst_27 = arith.constant 2.560000e+02 : f32
    %68 = vector.broadcast %cst_27 : f32 to vector<8x1xf32>
    %69 = arith.divf %67, %68 : vector<8x1xf32>
    %70 = vector.broadcast %62 : vector<8x1xf32> to vector<8x256xf32>
    %71 = arith.subf %58, %70 : vector<8x256xf32>
    %cst_28 = arith.constant 9.99999974E-6 : f32
    %72 = vector.broadcast %cst_28 : f32 to vector<8x1xf32>
    %73 = arith.addf %69, %72 : vector<8x1xf32>
    %74 = math.rsqrt %73 : vector<8x1xf32>
    %75 = vector.broadcast %74 : vector<8x1xf32> to vector<8x256xf32>
    %76 = arith.mulf %71, %75 : vector<8x256xf32>
    %cst_29 = arith.constant 0.000000e+00 : f32
    %77 = vector.broadcast %cst_29 : f32 to vector<8x256xf32>
    %78 = arith.cmpf oge, %76, %77 : vector<8x256xf32>
    %cst_30 = arith.constant 0.00999999977 : f32
    %79 = vector.broadcast %cst_30 : f32 to vector<8x256xf32>
    %80 = arith.mulf %79, %76 : vector<8x256xf32>
    %81 = arith.select %78, %76, %80 : vector<8x256xi1>, vector<8x256xf32>
    %82 = arith.truncf %81 : vector<8x256xf32> to vector<8x256xbf16>
    %c0_31 = arith.constant 0 : index
    %c0_32 = arith.constant 0 : index
    %83 = vector.load %arg6[%c0_31, %c0_32] : memref<256x64xbf16, #tpu.memory_space<vmem>>, vector<256x64xbf16>
    %cst_33 = arith.constant dense<0.000000e+00> : vector<8x64xf32>
    %84 = tpu.matmul %82, %83, %cst_33 {dimension_numbers = #tpu.dot_dimension_numbers<[1], [0], [0], [1], [0, 0, 1, 1], [], []>} : vector<8x256xbf16>, vector<256x64xbf16>, vector<8x64xf32> -> vector<8x64xf32>
    %c0_34 = arith.constant 0 : index
    %c0_35 = arith.constant 0 : index
    %85 = vector.load %arg7[%c0_34, %c0_35] : memref<1x64xf32, #tpu.memory_space<vmem>>, vector<1x64xf32>
    %86 = vector.broadcast %85 : vector<1x64xf32> to vector<8x64xf32>
    %87 = arith.addf %84, %86 : vector<8x64xf32>
    %88 = arith.addf %87, %29 : vector<8x64xf32>
    %c0_36 = arith.constant 0 : index
    %c0_37 = arith.constant 0 : index
    %89 = vector.load %arg8[%c0_36, %c0_37] : memref<8x64xf32, #tpu.memory_space<vmem>>, vector<8x64xf32>
    tpu.vector_store %arg8[%c0_36, %c0_37], %88 {strides = array<i32>} : memref<8x64xf32, #tpu.memory_space<vmem>>, vector<8x64xf32>,
    return
  }
  func.func @transform_0(%arg0: i32) -> (i32, i32) {
    %c0_i32 = arith.constant 0 : i32
    %c0_i32_0 = arith.constant 0 : i32
    return %arg0, %c0_i32 : i32, i32
  }
  func.func @transform_1(%arg0: i32) -> (i32, i32) {
    %c0_i32 = arith.constant 0 : i32
    %c0_i32_0 = arith.constant 0 : i32
    %c0_i32_1 = arith.constant 0 : i32
    return %c0_i32, %c0_i32_0 : i32, i32
  }
  func.func @transform_2(%arg0: i32) -> (i32, i32) {
    %c0_i32 = arith.constant 0 : i32
    %c0_i32_0 = arith.constant 0 : i32
    %c0_i32_1 = arith.constant 0 : i32
    return %c0_i32, %c0_i32_0 : i32, i32
  }
  func.func @transform_3(%arg0: i32) -> (i32, i32) {
    %c0_i32 = arith.constant 0 : i32
    %c0_i32_0 = arith.constant 0 : i32
    %c0_i32_1 = arith.constant 0 : i32
    return %c0_i32, %c0_i32_0 : i32, i32
  }
  func.func @transform_4(%arg0: i32) -> (i32, i32) {
    %c0_i32 = arith.constant 0 : i32
    %c0_i32_0 = arith.constant 0 : i32
    %c0_i32_1 = arith.constant 0 : i32
    return %c0_i32, %c0_i32_0 : i32, i32
  }
  func.func @transform_5(%arg0: i32) -> (i32, i32) {
    %c0_i32 = arith.constant 0 : i32
    %c0_i32_0 = arith.constant 0 : i32
    %c0_i32_1 = arith.constant 0 : i32
    return %c0_i32, %c0_i32_0 : i32, i32
  }
  func.func @transform_6(%arg0: i32) -> (i32, i32) {
    %c0_i32 = arith.constant 0 : i32
    %c0_i32_0 = arith.constant 0 : i32
    %c0_i32_1 = arith.constant 0 : i32
    return %c0_i32, %c0_i32_0 : i32, i32
  }
  func.func @transform_7(%arg0: i32) -> (i32, i32) {
    %c0_i32 = arith.constant 0 : i32
    %c0_i32_0 = arith.constant 0 : i32
    return %arg0, %c0_i32 : i32, i32
  }
}

</mosaic_0001>

<bundles_post_ra>
// kernel: fwd.2
= control target key start
LH: loop header
LB: loop body
LE: loop exit
PB: predicated region body
PF: predicated region fallthrough
CT: control target
= control target key end

     0   :  { %10 = vsyncpa [#allocation3], 0  ;;  %s660_s18 = smov 0   ;;  %s726_s0 = inlined_call_operand.vmem [shape: f32[16,32], index: 0, kind: input, shape index: {}]   ;;  %s727_s1 = inlined_call_operand.hbm [shape: bf16[32,128], index: 1, kind: input, shape index: {}]   ;;  %s728_s2 = inlined_call_operand.vmem [shape: f32[1,128], index: 2, kind: input, shape index: {}]   ;;  %s729_s3 = inlined_call_operand.vmem [shape: bf16[128,32], index: 3, kind: input, shape index: {}]   ;;  %s730_s4 = inlined_call_operand.vmem [shape: f32[1,32], index: 4, kind: input, shape index: {}]   ;;  %s731_s5 = inlined_call_operand.vmem [shape: f32[16,32], index: 5, kind: output, shape index: {}]  }
   0x1 LB: > { %s168_s21 = sshll.u32 %s727_s1, 4  ;;  %s488_s22 = sadd.s32 4294967295, %s623_s18   ;;  %s623_s18 = sphi %s660_s18, %s16_s18   ;;  %s169_s21 = int_to_ptr.hbm [resolvable:$true] %s168_s21 }
   0x2   : > { %p490_p0 = scmp.ge.s32.totalorder %s623_s18, 1  ;;  %p157_p1 = scmp.lt.s32.totalorder %s623_s18, 3 }
   0x3   : > { %p558_p2 = scmp.eq.s32.totalorder %s488_s22, 0  ;;  %s625_s23 = smov [#allocation2]  }
   0x4   : > { %p158_p3 = pnand %p490_p0, %p157_p1  ;;  %s170_s24 = sshll.u32 %s625_s23, 4  ;;  %s171_s24 = int_to_ptr.vmem [resolvable:$true] %s170_s24 }
   0x5   : > { %s626_s25 = smov 64   ;;  %s627_s26 = smov 4  }
   0x6   : > { %p554_p4 = pneg %p158_p3  ;;  %202 = sbr.rel (%p158_p3) target bundleno = 816 (0x330), region = 40 }
   0x8   : > { %p555_p5 = pnand %p558_p2, %p554_p4 }
   0xa   : > { %557 = dma.hbm_to_vmem [thread:$0]  (!%p555_p5), %s169_s21, 256, %s171_s24, [#allocation3], %s626_s25, %s626_s25, %s627_s26  }
   0xb   : > { %618 = dma.done.wait (%p558_p2), [#allocation3], 256  }
   0xc   : > { %620 = vsyncadd (%p558_p2), [#allocation3], 4294967040  ;;  %p229_p6 = scmp.lt.s32.totalorder %s488_s22, 1  ;;  %vm239_vm0 = vcmask 261120   ;;  %v628_v2 = vmov 32.0   ;;  %v541_v14 = vld [vmem:[#allocation2 + $0x8] sm:$0xff] }
   0xd   : > { %575 = vrcp.f32 %v628_v2  ;;  %302 = vmatpush.bf16.msra.mxu0 %v541_v14  ;;  %v540_v15 = vld [vmem:[#allocation2] sm:$0xff]  ;;  %v629_v34 = vmov 128.0   ;;  %v549_v35 = vld [vmem:[%s729_s3 + $0x38] sm:$0xff]  ;;  %v548_v46 = vld [vmem:[%s729_s3 + $0x30] sm:$0xff] }
   0xe   : > { %s733_s22 = smov (!%p229_p6, %s488_s22), 1  ;;  %v573_v30 = vld [vmem:[%s728_s2] ss:$0 sm:$0xff]  ;;  %408 = vmatpush.bf16.msra.mxu1 %v549_v35  ;;  %v547_v47 = vld [vmem:[%s729_s3 + $0x28] sm:$0xff]  ;;  %v545_v49 = vld [vmem:[%s729_s3 + $0x18] sm:$0xff] }
   0xf   : > { %s495_s27 = sshll.u32 %s733_s22, 3  ;;  %v546_v48 = vld [vmem:[%s729_s3 + $0x20] sm:$0xff]  ;;  %v544_v50 = vld [vmem:[%s729_s3 + $0x10] sm:$0xff]  ;;  %v543_v51 = vld [vmem:[%s729_s3 + $0x8] sm:$0xff] }
  0x10   : > { %s232_s30 = scalar_lea.vmem %s726_s0, %s495_s27  ;;  %v542_v52 = vld [vmem:[%s729_s3] sm:$0xff]  ;;  %s236_s6 = scalar_lea.vmem %s731_s5, %s495_s27 }
  0x11   : > { %v679_v0 = vld [vmem:[%s232_s30] sm:$0xff]  ;;  %303 = vmatpush.bf16.msra.mxu0 %v540_v15 }
  0x12   : > { %v240_v1 = vsel %vm239_vm0, %v679_v0, 0.0  ;;  %409 = vmatpush.bf16.msra.mxu1 %v548_v46 }
  0x13   : > { %241 = vadd.xlane.f32.xlu0 %v240_v1  ;;  %v576_v3 = vpop.eup %575 }
  0x14   : > { %v244_v4 = vmul.f32 32.0, %v576_v3  ;;  %vm248_vm1 = vweird.f32 %v576_v3 }
  0x16   : > { %v245_v5 = vsub.f32 1.0, %v244_v4  ;;  %410 = vmatpush.bf16.msra.mxu1 %v547_v47  ;;  %v574_v4 = vld [vmem:[%s730_s4] ss:$0 sm:$0xff] }
  0x18   : > { %v246_v6 = vmul.f32 %v576_v3, %v245_v5 }
  0x1a   : > { %v247_v7 = vadd.f32 %v576_v3, %v246_v6  ;;  %411 = vmatpush.bf16.msra.mxu1 %v546_v48 }
  0x1c   : > { %v249_v8 = vsel %vm248_vm1, %v576_v3, %v247_v7 }
  0x1e   : > { %412 = vmatpush.bf16.msra.mxu1 %v545_v49 }
  0x22   : > { %413 = vmatpush.bf16.msra.mxu1 %v544_v50 }
  0x26   : > { %414 = vmatpush.bf16.msra.mxu1 %v543_v51 }
  0x2a   : > { %415 = vmatpush.bf16.msra.mxu1 %v542_v52 }
  0x86   : > { %v242_v9 = vpop.xlane.xlu0 %241 }
  0x87   : > { %v250_v10 = vmul.f32 %v249_v8, %v242_v9 }
  0x89   : > { %v251_v11 = vsub.f32 %v679_v0, %v250_v10 }
  0x8b   : > { %v252_v12 = vmul.f32 %v251_v11, %v251_v11 }
  0x8d   : > { %v253_v13 = vsel %vm239_vm0, %v252_v12, 0.0 }
  0x8e   : > { %254 = vadd.xlane.f32.xlu0 %v253_v13 }
 0x101   : > { %v255_v16 = vpop.xlane.xlu0 %254 }
 0x102   : > { %v256_v17 = vmul.f32 %v255_v16, %v249_v8 }
 0x104   : > { %v257_v18 = vadd.f32 1e-05, %v256_v17 }
 0x106   : > { %577 = vrsqrt.f32 %v257_v18  ;;  %vm264_vm3 = vweird.f32 %v257_v18 }
 0x107   : > { %579 = vrcp.f32 %v629_v34 }
 0x10c   : > { %v578_v19 = vpop.eup %577 }
 0x10d   : > { %v259_v20 = vmul.f32 %v578_v19, %v257_v18  ;;  %vm265_vm2 = vweird.f32 %v578_v19  ;;  %v580_v36 = vpop.eup %579 }
 0x10e   : > { %vm266_vm4 = vmor %vm264_vm3, %vm265_vm2  ;;  %v312_v37 = vmul.f32 128.0, %v580_v36  ;;  %vm316_vm6 = vweird.f32 %v580_v36 }
 0x10f   : > { %v260_v21 = vmul.f32 %v578_v19, %v259_v20 }
 0x110   : > { %v313_v38 = vsub.f32 1.0, %v312_v37 }
 0x111   : > { %v261_v22 = vmul.f32 0.5, %v260_v21 }
 0x112   : > { %v314_v39 = vmul.f32 %v580_v36, %v313_v38 }
 0x113   : > { %v262_v23 = vsub.f32 1.5, %v261_v22 }
 0x114   : > { %v315_v40 = vadd.f32 %v580_v36, %v314_v39 }
 0x115   : > { %v263_v24 = vmul.f32 %v578_v19, %v262_v23 }
 0x116   : > { %v317_v41 = vsel %vm316_vm6, %v580_v36, %v315_v40 }
 0x117   : > { %v267_v25 = vsel %vm266_vm4, %v578_v19, %v263_v24 }
 0x118   : > { %v268_v26 = vmul.f32 %v267_v25, %v251_v11 }
 0x11a   : > { %vm269_vm5 = vcmp.ge.f32.partialorder %v268_v26, 0.0  ;;  %v270_v27 = vmul.f32 0.01, %v268_v26 }
 0x11c   : > { %v271_v28 = vsel %vm269_vm5, %v268_v26, %v270_v27 }
 0x11d   : > { %v272_v29 = vpack.c.bf16 %v271_v28, %v271_v28 }
 0x11f   : > { %505 = vmatmul.msk.bf16.vlgmr.msra.gmra.mxu0 %vm239_vm0, %v272_v29 }
 0x19c   : > { %v305_v31 = vpop.f32.mrf.mxu0 }
 0x19d   : > { %v306_v32 = vadd.f32 %v573_v30, %v305_v31 }
 0x19f   : > { %309 = vadd.xlane.f32.xlu1 %v306_v32 }
 0x1a4   : > { %v307_v33 = vpop.f32.mrf.mxu0 }
 0x212   : > { %v310_v42 = vpop.xlane.xlu1 %309 }
 0x213   : > { %v318_v43 = vmul.f32 %v317_v41, %v310_v42 }
 0x215   : > { %v319_v44 = vsub.f32 %v306_v32, %v318_v43 }
 0x217   : > { %v320_v45 = vmul.f32 %v319_v44, %v319_v44 }
 0x219   : > { %321 = vadd.xlane.f32.xlu1 %v320_v45 }
 0x28c   : > { %v322_v53 = vpop.xlane.xlu1 %321 }
 0x28d   : > { %v323_v54 = vmul.f32 %v322_v53, %v317_v41 }
 0x28f   : > { %v324_v55 = vadd.f32 1e-05, %v323_v54 }
 0x291   : > { %581 = vrsqrt.f32 %v324_v55  ;;  %vm331_vm8 = vweird.f32 %v324_v55 }
 0x297   : > { %v582_v56 = vpop.eup %581 }
 0x298   : > { %v326_v57 = vmul.f32 %v582_v56, %v324_v55  ;;  %vm332_vm7 = vweird.f32 %v582_v56 }
 0x299   : > { %vm333_vm9 = vmor %vm331_vm8, %vm332_vm7 }
 0x29a   : > { %v327_v58 = vmul.f32 %v582_v56, %v326_v57 }
 0x29c   : > { %v328_v59 = vmul.f32 0.5, %v327_v58 }
 0x29e   : > { %v329_v60 = vsub.f32 1.5, %v328_v59 }
 0x2a0   : > { %v330_v61 = vmul.f32 %v582_v56, %v329_v60 }
 0x2a2   : > { %v334_v62 = vsel %vm333_vm9, %v582_v56, %v330_v61 }
 0x2a3   : > { %v335_v63 = vmul.f32 %v334_v62, %v319_v44 }
 0x2a5   : > { %vm336_vm10 = vcmp.ge.f32.partialorder %v335_v63, 0.0  ;;  %v337_v1 = vmul.f32 0.01, %v335_v63 }
 0x2a7   : > { %v338_v2 = vsel %vm336_vm10, %v335_v63, %v337_v1 }
 0x2a8   : > { %v339_v3 = vpack.c.bf16 %v338_v2, %v338_v2 }
 0x2aa   : > { %416 = vmatmul.bf16.vlgmr.msra.gmra.mxu1 %v339_v3 }
 0x327   : > { %v417_v5 = vpop.f32.mrf.mxu1 }
 0x328   : > { %v418_v6 = vadd.f32 %v574_v4, %v417_v5 }
 0x32a   : > { %v421_v7 = vadd.f32 %v418_v6, %v679_v0 }
 0x32c   : > { %422 = vst.msk [vmem:[%s236_s6] sm:$0xff] %vm239_vm0, %v421_v7 }
 0x32f   : > { %v419_v8 = vpop.f32.mrf.mxu1 }
 0x330 PF: > { %s16_s18 = sadd.s32 1, %s623_s18  }
 0x331   : > { %p13_p7 = scmp.ge.s32.totalorder %s16_s18, 4  }
 0x333   :  { %15 = sbr.rel (!%p13_p7) target bundleno = 1 (0x1), region = 75 }
 0x338   :  { %442 = vsyncpa [#allocation3], 1 }
 0x339   :  { %444 = vsyncpa [#allocation3 + $0x1], 1 }

// kernel: fwd.3
= control target key start
LH: loop header
LB: loop body
LE: loop exit
PB: predicated region body
PF: predicated region fallthrough
CT: control target
= control target key end

     0   :  { %12 = vsyncpa [#allocation3], 0  ;;  %s1247_s0 = inlined_call_operand.vmem [shape: f32[16,32], index: 0, kind: input, shape index: {}]   ;;  %s1248_s1 = inlined_call_operand.vmem [shape: bf16[32,64], index: 1, kind: input, shape index: {}]   ;;  %s1249_s2 = inlined_call_operand.vmem [shape: f32[1,64], index: 2, kind: input, shape index: {}]   ;;  %s1250_s3 = inlined_call_operand.vmem [shape: bf16[64,256], index: 3, kind: input, shape index: {}]   ;;  %s1251_s4 = inlined_call_operand.vmem [shape: f32[1,256], index: 4, kind: input, shape index: {}]   ;;  %s1252_s5 = inlined_call_operand.vmem [shape: bf16[256,64], index: 5, kind: input, shape index: {}]   ;;  %s1253_s6 = inlined_call_operand.vmem [shape: f32[1,64], index: 6, kind: input, shape index: {}]   ;;  %s1254_s7 = inlined_call_operand.hbm [shape: f32[16,64], index: 7, kind: output, shape index: {}]  }
   0x1   :  { %14 = vsyncpa [#allocation3 + $0x1], 0  ;;  %s1033_s24 = smov 0   ;;  %s1035_s25 = smov 0  }
   0x2   :  { %s1037_s26 = smov 0   ;;  %s1039_s27 = smov 0  }
   0x3 LB: > { %s1054_s28 = sadd.s32 4294967295, %s989_s27   ;;  %s731_s29 = sadd.s32 4294967294, %s989_s27   ;;  %s989_s27 = sphi %s1039_s27, %s1260_s27   ;;  %s985_s26 = sphi %s1037_s26, %s1259_s26   ;;  %s981_s25 = sphi %s1035_s25, %s1258_s25   ;;  %s977_s24 = sphi %s1033_s24, %s1257_s24  }
   0x4   : > { %s1058_s30 = sadd.s32 1, %s989_s27   ;;  %s179_s8 = sadd.s32 1, %s985_s26 }
   0x5   : > { %s176_s9 = ssub.s32 %s989_s27, %s1058_s30  ;;  %p189_p0 = scmp.ne.s32.totalorder %s985_s26, %s981_s25 }
   0x6   : > { %p177_p1 = scmp.eq.s32.totalorder %s176_s9, 0  ;;  %p190_p2 = scmp.eq.s32.totalorder %s1054_s28, 1 }
   0x7   : > { %p195_p3 = scmp.ne.s32.totalorder %s981_s25, %s977_s24  ;;  %p196_p4 = scmp.eq.s32.totalorder %s731_s29, 1 }
   0x8   : > { %s1069_s10 = scalar_select %p177_p1, %s985_s26, %s179_s8  }
   0x9   : > { %p1071_p5 = por %p190_p2, %p189_p0  ;;  %p1075_p6 = por %p196_p4, %p195_p3 }
   0xa   : > { %p734_p7 = scmp.ge.s32.totalorder %s989_s27, 1  ;;  %p239_p8 = scmp.lt.s32.totalorder %s989_s27, 3 }
   0xc   : > { %p240_p9 = pnand %p734_p7, %p239_p8 }
   0xd   : > { %p270_p10 = scmp.lt.s32.totalorder (!%p240_p9), %s1054_s28, 1  ;;  %s267_s20 = sand.u32 (!%p240_p9), 1, %s981_s25  }
   0xe   : > { %243 = sbr.rel (%p240_p9) target bundleno = 1238 (0x4d6), region = 48  ;;  %s845_s22 = sshll.u32 (!%p240_p9), %s1054_s28, 3 }
   0xf   : > { %s667_s13 = scalar_lea.hbm (!%p240_p9), %s1254_s7, %s845_s22  ;;  %s947_s22 = scalar_lea.hbm (!%p240_p9), %s1254_s7, 16 }
  0x10   : > { %s671_s16 = sshll.u32 (!%p240_p9), %s667_s13, 4  ;;  %s672_s16 = int_to_ptr.hbm [resolvable:$true] %s671_s16 }
  0x13   : > { %v849_v0 = vld [vmem:[%s1248_s1 + $0x8] sm:$0xff]  ;;  %v848_v1 = vld [vmem:[%s1248_s1] sm:$0xff]  ;;  %s271_s17 = scalar_select %p270_p10, %s1054_s28, 1  ;;  %vm297_vm0 = vcmask 261120   ;;  %vm314_vm1 = vcmask 523264   ;;  %v991_v9 = vmov 64.0  }
  0x14   : > { %307 = vmatpush.bf16.msra.mxu1 %v849_v0  ;;  %v915_v4 = vld [vmem:[%s1249_s2] ss:$0 sm:$0xff]  ;;  %917 = vrcp.f32 %v991_v9  ;;  %v772_v40 = vld [vmem:[%s1250_s3 + $0x30] sm:$0xf]  ;;  %v857_v41 = vld [vmem:[%s1250_s3 + $0x34] sm:$0xf0] }
  0x15   : > { %s736_s18 = sshll.u32 %s271_s17, 3  ;;  %v856_v42 = vld [vmem:[%s1250_s3 + $0x34] sm:$0xf]  ;;  %v773_v43 = vor.u32 %v857_v41, %v772_v40  ;;  %v774_v44 = vld [vmem:[%s1250_s3 + $0x38] sm:$0xf0]  ;;  %s657_s28 = scalar_lea.sflag [#allocation3], %s267_s20 }
  0x16   : > { %s273_s21 = scalar_lea.vmem %s1247_s0, %s736_s18  ;;  %v777_v45 = vor.u32 %v856_v42, %v774_v44  ;;  %v764_v46 = vld [vmem:[%s1250_s3 + $0x20] sm:$0xf]  ;;  %v855_v47 = vld [vmem:[%s1250_s3 + $0x24] sm:$0xf0]  ;;  %v854_v48 = vld [vmem:[%s1250_s3 + $0x24] sm:$0xf] }
  0x17   : > { %v275_v2 = vld [vmem:[%s273_s21] sm:$0xff]  ;;  %v765_v49 = vor.u32 %v855_v47, %v764_v46  ;;  %v766_v50 = vld [vmem:[%s1250_s3 + $0x28] sm:$0xf0]  ;;  %v756_v52 = vld [vmem:[%s1250_s3 + $0x10] sm:$0xf]  ;;  %s735_s21 = sshll.u32 %s267_s20, 3 }
  0x18   : > { %308 = vmatpush.bf16.msra.mxu1 %v848_v1  ;;  %v276_v3 = vpack.c.bf16 %v275_v2, %v275_v2  ;;  %447 = vmatpush.bf16.msra.mxu2 %v777_v45  ;;  %v769_v51 = vor.u32 %v854_v48, %v766_v50  ;;  %v853_v53 = vld [vmem:[%s1250_s3 + $0x14] sm:$0xf0]  ;;  %v852_v54 = vld [vmem:[%s1250_s3 + $0x14] sm:$0xf]  ;;  %v758_v56 = vld [vmem:[%s1250_s3 + $0x18] sm:$0xf0] }
  0x19   : > { %v757_v55 = vor.u32 %v853_v53, %v756_v52  ;;  %v761_v57 = vor.u32 %v852_v54, %v758_v56  ;;  %v748_v58 = vld [vmem:[%s1250_s3] sm:$0xf]  ;;  %v851_v59 = vld [vmem:[%s1250_s3 + $0x4] sm:$0xf0]  ;;  %v850_v60 = vld [vmem:[%s1250_s3 + $0x4] sm:$0xf] }
  0x1a   : > { %v918_v10 = vpop.eup %917  ;;  %v749_v61 = vor.u32 %v851_v59, %v748_v58  ;;  %v750_v62 = vld [vmem:[%s1250_s3 + $0x8] sm:$0xf0]  ;;  %v864_v41 = vld [vmem:[%s1252_s5 + $0x30] sm:$0xff]  ;;  %v862_v45 = vld [vmem:[%s1252_s5 + $0x20] sm:$0xff]  ;;  %s269_s14 = scalar_lea.vmem [#allocation2], %s735_s21  ;;  %s941_s17 = sshra.s32 %s672_s16, 4  ;;  %s942_s17 = int_to_ptr.hbm [resolvable:$true] %s941_s17 }
  0x1b   : > { %745 = vmatmul.msk.bf16.vlgmr.msra.gmra.mxu1 %vm297_vm0, %v276_v3  ;;  %v319_v11 = vmul.f32 64.0, %v918_v10  ;;  %vm323_vm2 = vweird.f32 %v918_v10  ;;  %v753_v63 = vor.u32 %v850_v60, %v750_v62  ;;  %v872_v42 = vld [vmem:[%s1252_s5 + $0x70] sm:$0xff]  ;;  %v871_v44 = vld [vmem:[%s1252_s5 + $0x68] sm:$0xff]  ;;  %v870_v46 = vld [vmem:[%s1252_s5 + $0x60] sm:$0xff]  ;;  %s669_s15 = sshll.u32 %s269_s14, 4  ;;  %s943_s18 = scalar_lea.hbm %s942_s17, 8  ;;  %s670_s15 = int_to_ptr.vmem [resolvable:$true] %s669_s15 }
  0x1c   : > { %434 = vmatpush.bf16.msrb.mxu1 %v773_v43  ;;  %448 = vmatpush.bf16.msra.mxu2 %v769_v51  ;;  %v863_v43 = vld [vmem:[%s1252_s5 + $0x28] sm:$0xff]  ;;  %v861_v47 = vld [vmem:[%s1252_s5 + $0x18] sm:$0xff]  ;;  %v868_v50 = vld [vmem:[%s1252_s5 + $0x50] sm:$0xff]  ;;  %p944_p11 = scmp.ne.s32.totalorder %s942_s17, %s943_s18  ;;  %p948_p0 = scmp.lt.s32.totalorder %s942_s17, %s1254_s7 }
  0x1d   : > { %v320_v12 = vsub.f32 1.0, %v319_v11  ;;  %v869_v48 = vld [vmem:[%s1252_s5 + $0x58] sm:$0xff]  ;;  %v859_v51 = vld [vmem:[%s1252_s5 + $0x8] sm:$0xff]  ;;  %v858_v53 = vld [vmem:[%s1252_s5] sm:$0xff]  ;;  %p949_p1 = scmp.lt.s32.totalorder %s947_s22, %s943_s18 }
  0x1e   : > { %v867_v52 = vld [vmem:[%s1252_s5 + $0x48] sm:$0xff]  ;;  %v866_v54 = vld [vmem:[%s1252_s5 + $0x40] sm:$0xff]  ;;  %p945_p12 = pnand %p944_p11, %p1071_p5 }
  0x1f   : > { %v321_v13 = vmul.f32 %v918_v10, %v320_v12  ;;  %p950_p2 = por %p949_p1, %p948_p0 }
  0x20   : > { %435 = vmatpush.bf16.msrb.mxu1 %v765_v49  ;;  %449 = vmatpush.bf16.msra.mxu2 %v761_v57  ;;  %v860_v49 = vld [vmem:[%s1252_s5 + $0x10] sm:$0xff]  ;;  %p946_p13 = pneg %p945_p12 }
  0x21   : > { %v322_v14 = vadd.f32 %v918_v10, %v321_v13 }
  0x22   : > { %p951_p3 = pnand %p950_p2, %p946_p13 }
  0x23   : > { %v1096_v15 = vsel %vm323_vm2, %v918_v10, %v322_v14  ;;  %v381_v14 = vld [vmem:[%s1251_s4] sm:$0x3] }
  0x24   : > { %436 = vmatpush.bf16.msrb.mxu1 %v757_v55  ;;  %450 = vmatpush.bf16.msra.mxu2 %v753_v63 }
  0x28   : > { %437 = vmatpush.bf16.msrb.mxu1 %v749_v61 }
  0x98   : > { %v310_v5 = vpop.f32.mrf.mxu1 }
  0x99   : > { %v311_v6 = vadd.f32 %v915_v4, %v310_v5 }
  0x9b   : > { %v315_v7 = vsel %vm314_vm1, %v311_v6, 0.0 }
  0x9c   : > { %316 = vadd.xlane.f32.xlu0 %v315_v7 }
  0xa0   : > { %v312_v8 = vpop.f32.mrf.mxu1 }
 0x10f   : > { %v317_v16 = vpop.xlane.xlu0 %316 }
 0x110   : > { %v325_v17 = vmul.f32 %v1096_v15, %v317_v16  ;;  %v383_v16 = vperm.slane %v381_v14, 0 }
 0x112   : > { %v326_v18 = vsub.f32 %v311_v6, %v325_v17  ;;  %v384_v17 = vperm.slane %v381_v14, 1 }
 0x114   : > { %v327_v19 = vmul.f32 %v326_v18, %v326_v18 }
 0x116   : > { %v328_v20 = vsel %vm314_vm1, %v327_v19, 0.0 }
 0x117   : > { %329 = vadd.xlane.f32.xlu0 %v328_v20 }
 0x18a   : > { %v330_v21 = vpop.xlane.xlu0 %329 }
 0x18b   : > { %v331_v22 = vmul.f32 %v330_v21, %v1096_v15 }
 0x18d   : > { %v332_v23 = vadd.f32 1e-05, %v331_v22 }
 0x18f   : > { %919 = vrsqrt.f32 %v332_v23  ;;  %vm339_vm4 = vweird.f32 %v332_v23 }
 0x195   : > { %v920_v24 = vpop.eup %919 }
 0x196   : > { %v334_v25 = vmul.f32 %v920_v24, %v332_v23  ;;  %vm340_vm3 = vweird.f32 %v920_v24 }
 0x197   : > { %vm341_vm5 = vmor %vm339_vm4, %vm340_vm3 }
 0x198   : > { %v335_v26 = vmul.f32 %v920_v24, %v334_v25  ;;  %v865_v25 = vld [vmem:[%s1252_s5 + $0x38] sm:$0xff] }
 0x199   : > { %628 = vmatpush.bf16.msra.mxu3 %v865_v25 }
 0x19a   : > { %v336_v27 = vmul.f32 0.5, %v335_v26  ;;  %v873_v26 = vld [vmem:[%s1252_s5 + $0x78] sm:$0xff] }
 0x19b   : > { %641 = vmatpush.bf16.msra.mxu0 %v873_v26 }
 0x19c   : > { %v337_v28 = vsub.f32 1.5, %v336_v27 }
 0x19d   : > { %629 = vmatpush.bf16.msra.mxu3 %v864_v41 }
 0x19e   : > { %v338_v29 = vmul.f32 %v920_v24, %v337_v28 }
 0x19f   : > { %642 = vmatpush.bf16.msra.mxu0 %v872_v42 }
 0x1a0   : > { %v342_v30 = vsel %vm341_vm5, %v920_v24, %v338_v29  ;;  %v992_v24 = vmov 256.0  }
 0x1a1   : > { %v343_v31 = vmul.f32 %v342_v30, %v326_v18  ;;  %630 = vmatpush.bf16.msra.mxu3 %v863_v43 }
 0x1a3   : > { %vm344_vm6 = vcmp.ge.f32.partialorder %v343_v31, 0.0  ;;  %v345_v32 = vmul.f32 0.01, %v343_v31  ;;  %643 = vmatpush.bf16.msra.mxu0 %v871_v44 }
 0x1a5   : > { %v1101_v33 = vsel %vm344_vm6, %v343_v31, %v345_v32  ;;  %631 = vmatpush.bf16.msra.mxu3 %v862_v45 }
 0x1a6   : > { %v347_v34 = vsel %vm314_vm1, %v1101_v33, 0.0 }
 0x1a7   : > { %348 = vadd.xlane.f32.xlu1 %v347_v34  ;;  %644 = vmatpush.bf16.msra.mxu0 %v870_v46 }
 0x1a9   : > { %632 = vmatpush.bf16.msra.mxu3 %v861_v47 }
 0x1ab   : > { %645 = vmatpush.bf16.msra.mxu0 %v869_v48 }
 0x1ad   : > { %633 = vmatpush.bf16.msra.mxu3 %v860_v49 }
 0x1af   : > { %646 = vmatpush.bf16.msra.mxu0 %v868_v50 }
 0x1b1   : > { %634 = vmatpush.bf16.msra.mxu3 %v859_v51 }
 0x1b3   : > { %647 = vmatpush.bf16.msra.mxu0 %v867_v52 }
 0x1b5   : > { %635 = vmatpush.bf16.msra.mxu3 %v858_v53 }
 0x1b7   : > { %648 = vmatpush.bf16.msra.mxu0 %v866_v54 }
 0x21a   : > { %v349_v35 = vpop.xlane.xlu1 %348 }
 0x21b   : > { %v350_v36 = vmul.f32 %v349_v35, %v1096_v15 }
 0x21d   : > { %v351_v37 = vsub.f32 %v1101_v33, %v350_v36 }
 0x21f   : > { %v352_v38 = vmul.f32 %v351_v37, %v351_v37 }
 0x221   : > { %v353_v39 = vsel %vm314_vm1, %v352_v38, 0.0 }
 0x222   : > { %354 = vadd.xlane.f32.xlu1 %v353_v39 }
 0x295   : > { %v355_v0 = vpop.xlane.xlu1 %354 }
 0x296   : > { %v356_v1 = vmul.f32 %v355_v0, %v1096_v15 }
 0x298   : > { %v357_v2 = vadd.f32 1e-05, %v356_v1 }
 0x29a   : > { %921 = vrsqrt.f32 %v357_v2  ;;  %vm364_vm8 = vweird.f32 %v357_v2 }
 0x29b   : > { %923 = vrcp.f32 %v992_v24 }
 0x2a0   : > { %v922_v3 = vpop.eup %921 }
 0x2a1   : > { %v359_v4 = vmul.f32 %v922_v3, %v357_v2  ;;  %vm365_vm7 = vweird.f32 %v922_v3  ;;  %v924_v27 = vpop.eup %923 }
 0x2a2   : > { %vm366_vm9 = vmor %vm364_vm8, %vm365_vm7  ;;  %v460_v28 = vmul.f32 256.0, %v924_v27  ;;  %vm464_vm11 = vweird.f32 %v924_v27 }
 0x2a3   : > { %v360_v5 = vmul.f32 %v922_v3, %v359_v4 }
 0x2a4   : > { %v461_v29 = vsub.f32 1.0, %v460_v28 }
 0x2a5   : > { %v361_v6 = vmul.f32 0.5, %v360_v5 }
 0x2a6   : > { %v462_v30 = vmul.f32 %v924_v27, %v461_v29 }
 0x2a7   : > { %v362_v7 = vsub.f32 1.5, %v361_v6 }
 0x2a8   : > { %v463_v31 = vadd.f32 %v924_v27, %v462_v30 }
 0x2a9   : > { %v363_v8 = vmul.f32 %v922_v3, %v362_v7 }
 0x2aa   : > { %v465_v32 = vsel %vm464_vm11, %v924_v27, %v463_v31 }
 0x2ab   : > { %v367_v9 = vsel %vm366_vm9, %v922_v3, %v363_v8 }
 0x2ac   : > { %v368_v10 = vmul.f32 %v367_v9, %v351_v37 }
 0x2ae   : > { %vm369_vm10 = vcmp.ge.f32.partialorder %v368_v10, 0.0  ;;  %v370_v11 = vmul.f32 0.01, %v368_v10 }
 0x2b0   : > { %v371_v12 = vsel %vm369_vm10, %v368_v10, %v370_v11  ;;  %v916_v10 = vld [vmem:[%s1253_s6] ss:$0 sm:$0xff] }
 0x2b1   : > { %v372_v13 = vpack.c.bf16 %v371_v12, %v371_v12 }
 0x2b3   : > { %778 = vmatmul.msk.bf16.vlgmr.msrb.gmra.mxu1 %vm314_vm1, %v372_v13  ;;  %779 = vmatmul.msk.bf16.vlgmr.msra.gmra.mxu2 %vm314_vm1, %v372_v13 }
 0x330   : > { %v439_v15 = vpop.f32.mrf.mxu1 }
 0x331   : > { %v440_v19 = vadd.f32 %v439_v15, %v383_v16 }
 0x336   : > { %v452_v18 = vpop.f32.mrf.mxu2 }
 0x337   : > { %v453_v20 = vadd.f32 %v452_v18, %v384_v17 }
 0x338   : > { %v441_v21 = vpop.f32.mrf.mxu1 }
 0x339   : > { %v456_v22 = vadd.f32 %v453_v20, %v440_v19 }
 0x33b   : > { %457 = vadd.xlane.f32.xlu2 %v456_v22 }
 0x33e   : > { %v454_v23 = vpop.f32.mrf.mxu2 }
 0x3ae   : > { %v458_v34 = vpop.xlane.xlu2 %457 }
 0x3af   : > { %v466_v35 = vmul.f32 %v465_v32, %v458_v34 }
 0x3b1   : > { %v467_v36 = vsub.f32 %v440_v19, %v466_v35  ;;  %v468_v37 = vsub.f32 %v453_v20, %v466_v35 }
 0x3b3   : > { %v469_v38 = vmul.f32 %v467_v36, %v467_v36  ;;  %v470_v39 = vmul.f32 %v468_v37, %v468_v37 }
 0x3b5   : > { %v471_v40 = vadd.f32 %v470_v39, %v469_v38 }
 0x3b7   : > { %472 = vadd.xlane.f32.xlu2 %v471_v40 }
 0x42a   : > { %v473_v55 = vpop.xlane.xlu2 %472 }
 0x42b   : > { %v474_v56 = vmul.f32 %v473_v55, %v465_v32 }
 0x42d   : > { %v475_v57 = vadd.f32 1e-05, %v474_v56 }
 0x42f   : > { %925 = vrsqrt.f32 %v475_v57  ;;  %vm482_vm13 = vweird.f32 %v475_v57 }
 0x435   : > { %v926_v58 = vpop.eup %925 }
 0x436   : > { %v477_v59 = vmul.f32 %v926_v58, %v475_v57  ;;  %vm483_vm12 = vweird.f32 %v926_v58 }
 0x437   : > { %vm484_vm14 = vmor %vm482_vm13, %vm483_vm12 }
 0x438   : > { %v478_v60 = vmul.f32 %v926_v58, %v477_v59 }
 0x43a   : > { %v479_v61 = vmul.f32 0.5, %v478_v60 }
 0x43c   : > { %v480_v62 = vsub.f32 1.5, %v479_v61 }
 0x43e   : > { %v481_v63 = vmul.f32 %v926_v58, %v480_v62 }
 0x440   : > { %v485_v0 = vsel %vm484_vm14, %v926_v58, %v481_v63 }
 0x441   : > { %v486_v1 = vmul.f32 %v485_v0, %v467_v36  ;;  %v487_v2 = vmul.f32 %v485_v0, %v468_v37 }
 0x443   : > { %vm488_vm15 = vcmp.ge.f32.partialorder %v486_v1, 0.0  ;;  %v490_v3 = vmul.f32 0.01, %v486_v1  ;;  %vm489_vm0 = vcmp.ge.f32.partialorder %v487_v2, 0.0  ;;  %v491_v4 = vmul.f32 0.01, %v487_v2 }
 0x445   : > { %v492_v5 = vsel %vm488_vm15, %v486_v1, %v490_v3  ;;  %v493_v6 = vsel %vm489_vm0, %v487_v2, %v491_v4 }
 0x446   : > { %v494_v7 = vpack.c.bf16 %v492_v5, %v492_v5  ;;  %v495_v8 = vpack.c.bf16 %v493_v6, %v493_v6 }
 0x448   : > { %636 = vmatmul.bf16.vlgmr.msra.gmra.mxu3 %v494_v7  ;;  %649 = vmatmul.bf16.vlgmr.msra.gmra.mxu0 %v495_v8 }
 0x4c5   : > { %v650_v9 = vpop.f32.mrf.mxu0 }
 0x4cb   : > { %v637_v11 = vpop.f32.mrf.mxu3 }
 0x4cc   : > { %v638_v12 = vadd.f32 %v916_v10, %v637_v11 }
 0x4cd   : > { %v652_v13 = vpop.f32.mrf.mxu0 }
 0x4ce   : > { %v651_v14 = vadd.f32 %v650_v9, %v638_v12 }
 0x4d0   : > { %v654_v15 = vadd.f32 %v651_v14, %v1101_v33 }
 0x4d2   : > { %655 = vst.msk [vmem:[%s269_s14] sm:$0xff] %vm314_vm1, %v654_v15 }
 0x4d3   : > { %v639_v16 = vpop.f32.mrf.mxu3 }
 0x4d4   : > { %954 = shalt.err (!%p951_p3)
}
 0x4d5   : > { %874 = dma.vmem_to_hbm [thread:$0]  (%p1071_p5), %s670_s15, 128, %s672_s16, %s657_s28  }
 0x4d6 PF: > { %p880_p4 = scmp.ge.s32.totalorder %s989_s27, 2  ;;  %s683_s20 = sand.u32 1, %s977_s24  }
 0x4d7   : > { %s684_s8 = scalar_lea.sflag [#allocation3], %s683_s20 }
 0x4d8   : > { %p877_p7 = pnand %p880_p4, %p1075_p6 }
 0x4da   : > { %p878_p8 = pneg %p877_p7 }
 0x4dc   : > { %972 = dma.done.wait (%p878_p8), %s684_s8, 128  }
 0x4dd   : > { %974 = vsyncadd (%p878_p8), %s684_s8, 4294967168  ;;  %p17_p9 = scmp.ge.s32.totalorder %s1058_s30, 4   ;;  %s1257_s24 = smov %s981_s25 }
 0x4de   : > { %s1258_s25 = smov %s985_s26  ;;  %s1259_s26 = smov %s1069_s10 }
 0x4df   : > { %s1260_s27 = smov %s1058_s30  ;;  %19 = sbr.rel (!%p17_p9) target bundleno = 3 (0x3), region = 83 }
 0x4e4   :  { %690 = vsyncpa [#allocation3], 1 }
 0x4e5   :  { %692 = vsyncpa [#allocation3 + $0x1], 1 }

</bundles_post_ra>
